<compile_context>
chip_gen: v7x
topology: tpu7x:2x2x1
jax: 0.10.0
libtpu: 0.0.40
codegen_flags: <defaults>
</compile_context>

<pallas_src>
import functools

import jax
import jax.numpy as jnp
from jax.experimental import pallas as pl
from jax.experimental.pallas import tpu as pltpu


def _kl_div_kernel(inp_ref, tgt_ref, out_ref, *, lad, n_rows, tile_n):
    """One batch tile: masked elementwise KL, per-row weight, tile partial sum."""
    i = pl.program_id(0)

    x = inp_ref[...].astype(jnp.float32)     # probabilities (kernel takes log)
    t = tgt_ref[...].astype(jnp.float32)

    # Mask rows past the end of the batch (ragged last tile): zero their target
    # so they contribute exactly 0 to the partial sum (and no NaNs from garbage).
    if n_rows % tile_n != 0:
        row_ids = jax.lax.broadcasted_iota(jnp.int32, t.shape, 0) + i * tile_n
        t = jnp.where(row_ids < n_rows, t, 0.0)

    # kl = t * (log t - log x) = t * log(t / x); single log per element.
    # Guard the t == 0 branch (and any garbage x in masked rows) before the log.
    pos = t > 0.0
    safe_t = jnp.where(pos, t, 1.0)
    safe_x = jnp.where(pos, x, 1.0)
    kl = t * jnp.log(safe_t / safe_x)                    # (tile_n, C), 0 where t == 0

    row_sum = jnp.sum(kl, axis=1, keepdims=True)         # (tile_n, 1)  un-normalised
    t_max = jnp.max(t, axis=1, keepdims=True)            # (tile_n, 1)

    # weights = 1 + (1 - max)**lad, robust for max == 1 and lad == 0.
    base = 1.0 - t_max
    if float(lad) == 0.0:
        pw = jnp.ones_like(base)                         # x**0 == 1 (incl. 0**0)
    else:
        tiny = jnp.float32(jnp.finfo(jnp.float32).tiny)
        pw = jnp.where(
            base > 0.0,
            jnp.exp(jnp.float32(lad) * jnp.log(jnp.maximum(base, tiny))),
            0.0,                                         # 0**lad == 0 for lad > 0
        )
    weights = 1.0 + pw                                   # (tile_n, 1)

    # Un-normalised weighted partial sum for this tile; 1/(N*C) folded in later.
    partial = jnp.sum(row_sum * weights)                 # scalar
    out_ref[...] = partial * jnp.ones(out_ref.shape, jnp.float32)


def _pick_tile_n(n, c, itemsize):
    """Largest batch tile (multiple of 8) with ~2 MiB per input tile."""
    budget_bytes = 2 * 1024 * 1024
    t = budget_bytes // max(1, c * itemsize)
    if t >= n:
        return n                                          # single tile == full dim
    t = max(8, (t // 8) * 8)                              # sublane-aligned
    return t


def kl_div_loss(inp, tgt, lad, *, tile_n=None):
    """inp, tgt: (N, C) probability arrays (any float dtype). lad: static Python scalar."""
    assert inp.shape == tgt.shape and inp.ndim == 2
    n, c = inp.shape
    lad = float(lad)

    itemsize = max(jnp.dtype(inp.dtype).itemsize, jnp.dtype(tgt.dtype).itemsize)
    if tile_n is None:
        tile_n = _pick_tile_n(n, c, itemsize)
    num_tiles = pl.cdiv(n, tile_n)
    # TODO(synk): for vocab-scale C (C*4B per row near the tile budget) also tile
    # the class dim with an "arbitrary" grid axis carrying row-sum/row-max scratch.

    kernel = functools.partial(_kl_div_kernel, lad=lad, n_rows=n, tile_n=tile_n)

    partials = pl.pallas_call(
        kernel,
        out_shape=jax.ShapeDtypeStruct((num_tiles, 8, 128), jnp.float32),
        grid=(num_tiles,),
        in_specs=[
            pl.BlockSpec((tile_n, c), lambda i: (i, 0)),   # input  tile (native dtype)
            pl.BlockSpec((tile_n, c), lambda i: (i, 0)),   # target tile (native dtype)
        ],
        out_specs=pl.BlockSpec((1, 8, 128), lambda i: (i, 0, 0)),
        compiler_params=pltpu.CompilerParams(
            dimension_semantics=("parallel",),             # shard tiles across TCs (v7x)
        ),
    )(inp, tgt)

    # Finish the reduction (tiny) and apply the folded 1/(N*C) normalisation.
    return jnp.sum(partials[:, 0, 0]) * (1.0 / (n * c))


def _reference(inp, tgt, lad):
    """Pure-JAX reference mirroring the PyTorch module."""
    inp = inp.astype(jnp.float32)
    tgt = tgt.astype(jnp.float32)
    x = jnp.log(inp)
    kl = jnp.where(tgt > 0.0, tgt * jnp.log(tgt), 0.0) - tgt * x
    t_max = jnp.max(tgt, axis=1)
    weights = 1.0 + (1.0 - t_max) ** lad
    return jnp.mean(jnp.mean(kl, axis=1) * weights)


if __name__ == "__main__":
    key = jax.random.PRNGKey(0)
    k1, k2, k3, k4 = jax.random.split(key, 4)
    lad = 2.0

    # Case 1: small (batch, classes), single tile, f32 inputs.
    N1, C1 = 8, 32
    inp1 = jax.nn.softmax(jax.random.normal(k1, (N1, C1), dtype=jnp.float32), axis=1)
    tgt1 = jax.nn.softmax(jax.random.normal(k2, (N1, C1), dtype=jnp.float32), axis=1)
    loss1 = jax.block_until_ready(kl_div_loss(inp1, tgt1, lad))
    ref1 = jax.block_until_ready(_reference(inp1, tgt1, lad))
    assert jnp.isfinite(loss1), f"non-finite loss: {loss1}"
    assert jnp.allclose(loss1, ref1, rtol=1e-5, atol=1e-6), f"mismatch: {loss1} vs {ref1}"

    # Case 2: ragged batch (N not a multiple of the tile), forced multi-tile grid,
    # bf16 inputs fed to the kernel in their native dtype (cast happens in-kernel).
    N2, C2 = 20, 128
    inp2 = jax.nn.softmax(jax.random.normal(k3, (N2, C2), dtype=jnp.float32), axis=1)
    tgt2 = jax.nn.softmax(jax.random.normal(k4, (N2, C2), dtype=jnp.float32), axis=1)
    loss2 = jax.block_until_ready(
        kl_div_loss(inp2.astype(jnp.bfloat16), tgt2.astype(jnp.bfloat16), lad, tile_n=8)
    )
    ref2 = jax.block_until_ready(
        _reference(inp2.astype(jnp.bfloat16), tgt2.astype(jnp.bfloat16), lad)
    )
    assert jnp.isfinite(loss2), f"non-finite loss: {loss2}"
    assert jnp.allclose(loss2, ref2, rtol=2e-2, atol=1e-4), f"mismatch: {loss2} vs {ref2}"

    print("KERNEL_OK")
</pallas_src>

<mosaic_0001>
module attributes {stable_mosaic.version = 11 : i64} {
  func.func @_kl_div_kernel(%arg0: i32, %arg1: memref<8x32xf32, #tpu.memory_space<vmem>>, %arg2: memref<8x32xf32, #tpu.memory_space<vmem>>, %arg3: memref<1x8x128xf32, #tpu.memory_space<vmem>>) attributes {dimension_semantics = [#tpu.dimension_semantics<parallel>], iteration_bounds = array<i64: 1>, scalar_prefetch = 0 : i64, scratch_operands = 0 : i64, tpu.core_type = #tpu.core_type<tc>, window_params = [{transform_indices = @transform_0, window_bounds = array<i64: 8, 32>}, {transform_indices = @transform_1, window_bounds = array<i64: 8, 32>}, {transform_indices = @transform_2, window_bounds = array<i64: 1, 8, 128>}]} {
    %c0 = arith.constant 0 : index
    %c0_0 = arith.constant 0 : index
    %0 = vector.load %arg1[%c0, %c0_0] : memref<8x32xf32, #tpu.memory_space<vmem>>, vector<8x32xf32>
    %c0_1 = arith.constant 0 : index
    %c0_2 = arith.constant 0 : index
    %1 = vector.load %arg2[%c0_1, %c0_2] : memref<8x32xf32, #tpu.memory_space<vmem>>, vector<8x32xf32>
    %cst = arith.constant 0.000000e+00 : f32
    %2 = vector.broadcast %cst : f32 to vector<8x32xf32>
    %3 = arith.cmpf ogt, %1, %2 : vector<8x32xf32>
    %cst_3 = arith.constant 1.000000e+00 : f32
    %4 = vector.broadcast %cst_3 : f32 to vector<8x32xf32>
    %5 = arith.select %3, %1, %4 : vector<8x32xi1>, vector<8x32xf32>
    %cst_4 = arith.constant 1.000000e+00 : f32
    %6 = vector.broadcast %cst_4 : f32 to vector<8x32xf32>
    %7 = arith.select %3, %0, %6 : vector<8x32xi1>, vector<8x32xf32>
    %8 = arith.divf %5, %7 : vector<8x32xf32>
    %9 = math.log %8 : vector<8x32xf32>
    %10 = arith.mulf %1, %9 : vector<8x32xf32>
    %cst_5 = arith.constant dense<0.000000e+00> : vector<8xf32>
    %11 = vector.multi_reduction <add>, %10, %cst_5 [1] : vector<8x32xf32> to vector<8xf32>
    %12 = vector.shape_cast %11 : vector<8xf32> to vector<8x1xf32>
    %cst_6 = arith.constant dense<0xFF800000> : vector<8xf32>
    %13 = vector.multi_reduction <maximumf>, %1, %cst_6 [1] : vector<8x32xf32> to vector<8xf32>
    %14 = vector.shape_cast %13 : vector<8xf32> to vector<8x1xf32>
    %cst_7 = arith.constant 1.000000e+00 : f32
    %15 = vector.broadcast %cst_7 : f32 to vector<8x1xf32>
    %16 = arith.subf %15, %14 : vector<8x1xf32>
    %cst_8 = arith.constant 0.000000e+00 : f32
    %17 = vector.broadcast %cst_8 : f32 to vector<8x1xf32>
    %18 = arith.cmpf ogt, %16, %17 : vector<8x1xf32>
    %cst_9 = arith.constant 1.17549435E-38 : f32
    %19 = vector.broadcast %cst_9 : f32 to vector<8x1xf32>
    %20 = arith.maximumf %16, %19 : vector<8x1xf32>
    %21 = math.log %20 : vector<8x1xf32>
    %cst_10 = arith.constant 2.000000e+00 : f32
    %22 = vector.broadcast %cst_10 : f32 to vector<8x1xf32>
    %23 = arith.mulf %22, %21 : vector<8x1xf32>
    %24 = math.exp %23 : vector<8x1xf32>
    %cst_11 = arith.constant 0.000000e+00 : f32
    %25 = vector.broadcast %cst_11 : f32 to vector<8x1xf32>
    %26 = arith.select %18, %24, %25 : vector<8x1xi1>, vector<8x1xf32>
    %cst_12 = arith.constant 1.000000e+00 : f32
    %27 = vector.broadcast %cst_12 : f32 to vector<8x1xf32>
    %28 = arith.addf %27, %26 : vector<8x1xf32>
    %29 = arith.mulf %12, %28 : vector<8x1xf32>
    %30 = vector.shape_cast %29 : vector<8x1xf32> to vector<1x8x1xf32>
    %cst_13 = arith.constant dense<0.000000e+00> : vector<1xf32>
    %31 = vector.multi_reduction <add>, %30, %cst_13 [1, 2] : vector<1x8x1xf32> to vector<1xf32>
    %32 = vector.shape_cast %31 : vector<1xf32> to vector<1x1x1xf32>
    %33 = vector.extract %32[0, 0, 0] : f32 from vector<1x1x1xf32>
    %cst_14 = arith.constant 1.000000e+00 : f32
    %34 = vector.broadcast %cst_14 : f32 to vector<1x8x128xf32>
    %35 = vector.broadcast %33 : f32 to vector<1x8x128xf32>
    %36 = arith.mulf %35, %34 : vector<1x8x128xf32>
    %c0_15 = arith.constant 0 : index
    %c0_16 = arith.constant 0 : index
    %c0_17 = arith.constant 0 : index
    %37 = vector.load %arg3[%c0_15, %c0_16, %c0_17] : memref<1x8x128xf32, #tpu.memory_space<vmem>>, vector<1x8x128xf32>
    tpu.vector_store %arg3[%c0_15, %c0_16, %c0_17], %36 {strides = array<i32>} : memref<1x8x128xf32, #tpu.memory_space<vmem>>, vector<1x8x128xf32>,
    return
  }
  func.func @transform_0(%arg0: i32) -> (i32, i32) {
    %c0_i32 = arith.constant 0 : i32
    %c0_i32_0 = arith.constant 0 : i32
    return %arg0, %c0_i32 : i32, i32
  }
  func.func @transform_1(%arg0: i32) -> (i32, i32) {
    %c0_i32 = arith.constant 0 : i32
    %c0_i32_0 = arith.constant 0 : i32
    return %arg0, %c0_i32 : i32, i32
  }
  func.func @transform_2(%arg0: i32) -> (i32, i32, i32) {
    %c0_i32 = arith.constant 0 : i32
    %c0_i32_0 = arith.constant 0 : i32
    %c0_i32_1 = arith.constant 0 : i32
    return %arg0, %c0_i32, %c0_i32_0 : i32, i32, i32
  }
}

</mosaic_0001>

<bundles_post_ra>
// kernel: tpu_custom_call.1
= control target key start
LH: loop header
LB: loop body
LE: loop exit
PB: predicated region body
PF: predicated region fallthrough
CT: control target
= control target key end

     0   :  { %7 = vsyncpa [#allocation3], 0  ;;  %s232_s0 = inlined_call_operand.hbm [shape: f32[8,32], index: 0, kind: input, shape index: {}]   ;;  %s233_s1 = inlined_call_operand.hbm [shape: f32[8,32], index: 1, kind: input, shape index: {}]   ;;  %s234_s2 = inlined_call_operand.hbm [shape: f32[1,8,128], index: 2, kind: output, shape index: {}]  }
   0x1   :  { %8 = vsyncpa [#allocation6], 0 }
   0x2   :  { %9 = vsyncpa [#allocation4], 0  ;;  %s178_s9 = smov [#allocation2]   ;;  %s179_s11 = smov [#allocation5]  }
   0x3   :  { %s16_s10 = sshll.u32 %s178_s9, 4  ;;  %s26_s12 = sshll.u32 %s179_s11, 4  ;;  %s17_s10 = int_to_ptr.vmem [resolvable:$true] %s16_s10  ;;  %s27_s12 = int_to_ptr.vmem [resolvable:$true] %s26_s12 }
   0x4   :  { %s106_s15 = scalar_lea.hbm %s232_s0, 128 }
   0x5   :  { %p107_p0 = scmp.ne.s32.totalorder %s232_s0, %s106_s15  ;;  %p110_p1 = scmp.lt.u32.totalorder %s106_s15, %s232_s0 }
   0x7   :  { %p112_p2 = pnand %p110_p1, %p107_p0 }
   0x9   :  { %115 = shalt.err (!%p112_p2)
}
   0xa   :  { %s116_s20 = scalar_lea.vmem %s17_s10, 128  ;;  %p121_p4 = scmp.lt.s32.totalorder %s17_s10, %s17_s10 }
   0xb   :  { %p117_p3 = scmp.ne.s32.totalorder %s17_s10, %s116_s20  ;;  %p122_p5 = scmp.lt.s32.totalorder %s116_s20, %s116_s20 }
   0xd   :  { %p123_p6 = por %p122_p5, %p121_p4 }
   0xf   :  { %p124_p7 = pnand %p123_p6, %p117_p3 }
  0x11   :  { %127 = shalt.err (!%p124_p7)
}
  0x12   :  { %19 = dma.hbm_to_vmem [thread:$0]  %s232_s0, 128, %s17_s10, [#allocation3]  }
  0x13   :  { %s128_s25 = scalar_lea.hbm %s233_s1, 128 }
  0x14   :  { %p129_p8 = scmp.ne.s32.totalorder %s233_s1, %s128_s25  ;;  %p132_p9 = scmp.lt.u32.totalorder %s128_s25, %s233_s1 }
  0x16   :  { %p134_p10 = pnand %p132_p9, %p129_p8 }
  0x18   :  { %137 = shalt.err (!%p134_p10)
}
  0x19   :  { %s138_s30 = scalar_lea.vmem %s27_s12, 128  ;;  %p143_p12 = scmp.lt.s32.totalorder %s27_s12, %s27_s12 }
  0x1a   :  { %p139_p11 = scmp.ne.s32.totalorder %s27_s12, %s138_s30  ;;  %p144_p13 = scmp.lt.s32.totalorder %s138_s30, %s138_s30 }
  0x1c   :  { %p145_p0 = por %p144_p13, %p143_p12 }
  0x1e   :  { %p146_p1 = pnand %p145_p0, %p139_p11 }
  0x20   :  { %149 = shalt.err (!%p146_p1)
}
  0x21   :  { %29 = dma.hbm_to_vmem [thread:$0]  %s233_s1, 128, %s27_s12, [#allocation6]  }
  0x22   :  { %172 = dma.done.wait [#allocation3], 128  }
  0x23   :  { %173 = vsyncadd [#allocation3], 4294967168 }
  0x24   :  { %174 = dma.done.wait [#allocation6], 128  }
  0x25   :  { %175 = vsyncadd [#allocation6], 4294967168  ;;  %vm46_vm0 = vcmask 261120   ;;  %v37_v0 = vld [vmem:[#allocation5] sm:$0xff]  ;;  %v36_v1 = vld [vmem:[#allocation2] sm:$0xff]  ;;  %vm64_vm3 = vcmask 7168  }
  0x26   :  { %v50_v2 = vsel %vm46_vm0, %v37_v0, -inf  ;;  %vm38_vm1 = vcmp.gt.f32.partialorder %v37_v0, 0.0  ;;  %s180_s1 = smov [#allocation7]  }
  0x27   :  { %51 = vmax.xlane.f32.xlu0 %v50_v2  ;;  %v40_v3 = vsel %vm38_vm1, %v36_v1, 1.0  ;;  %v39_v4 = vsel %vm38_vm1, %v37_v0, 1.0  ;;  %s83_s4 = sshll.u32 %s180_s1, 4  ;;  %s84_s4 = int_to_ptr.vmem [resolvable:$true] %s83_s4 }
  0x28   :  { %98 = vrcp.f32 %v40_v3  ;;  %s150_s6 = scalar_lea.vmem %s84_s4, 128  ;;  %p155_p3 = scmp.lt.s32.totalorder %s84_s4, %s84_s4 }
  0x29   :  { %p151_p2 = scmp.ne.s32.totalorder %s84_s4, %s150_s6  ;;  %p156_p4 = scmp.lt.s32.totalorder %s150_s6, %s150_s6 }
  0x2b   :  { %p157_p5 = por %p156_p4, %p155_p3 }
  0x2d   :  { %p158_p6 = pnand %p157_p5, %p151_p2 }
  0x32   :  { %v99_v5 = vpop.eup %98 }
  0x33   :  { %v42_v6 = vmul.f32 %v99_v5, %v39_v4 }
  0x35   :  { %100 = vlog2.f32 %v42_v6 }
  0x3f   :  { %v101_v7 = vpop.eup %100 }
  0x40   :  { %v44_v8 = vmul.f32 0.6931472, %v101_v7 }
  0x42   :  { %v45_v9 = vmul.f32 %v44_v8, %v37_v0 }
  0x44   :  { %v47_v10 = vsel %vm46_vm0, %v45_v9, 0.0 }
  0x45   :  { %48 = vadd.xlane.f32.xlu0 %v47_v10 }
  0xb4   :  { %v52_v11 = vpop.xlane.xlu0 %51 }
  0xb5   :  { %v53_v12 = vsub.f32 1.0, %v52_v11 }
  0xb7   :  { %v55_v13 = vmax.f32 %v53_v12, 1.1754944e-38  ;;  %vm54_vm2 = vcmp.gt.f32.partialorder %v53_v12, 0.0 }
  0xb9   :  { %102 = vlog2.f32 %v55_v13 }
  0xc3   :  { %v103_v14 = vpop.eup %102 }
  0xc4   :  { %v57_v15 = vmul.f32 0.6931472, %v103_v14 }
  0xc6   :  { %v58_v16 = vmul.f32 2.0, %v57_v15 }
  0xc8   :  { %v59_v17 = vmul.f32 1.442695, %v58_v16 }
  0xca   :  { %104 = vpow2.f32 %v59_v17 }
  0xd2   :  { %v49_v20 = vpop.xlane.xlu0 %48 }
  0xd4   :  { %v105_v18 = vpop.eup %104 }
  0xd5   :  { %v61_v19 = vsel %vm54_vm2, %v105_v18, 0.0 }
  0xd6   :  { %v62_v21 = vadd.f32 1.0, %v61_v19 }
  0xd8   :  { %v63_v22 = vmul.f32 %v62_v21, %v49_v20 }
  0xda   :  { %v65_v23 = vsel %vm64_vm3, %v63_v22, 0.0 }
  0xdb   :  { %66 = vadd.xlane.f32.xlu1 %v65_v23 }
 0x168   :  { %v67_v24 = vpop.xlane.xlu1 %66 }
 0x169   :  { %v68_v25 = vrot.slane %v67_v24, 4 }
 0x16b   :  { %v69_v26 = vadd.f32 %v68_v25, %v67_v24 }
 0x16d   :  { %v70_v27 = vrot.slane %v69_v26, 2 }
 0x16f   :  { %v71_v28 = vadd.f32 %v70_v27, %v69_v26 }
 0x171   :  { %v72_v29 = vrot.slane %v71_v28, 1 }
 0x173   :  { %v73_v30 = vadd.f32 %v72_v29, %v71_v28 }
 0x175   :  { %93 = vpush %v73_v30 }
 0x1a6   :  { %s94_s5 = spop %93 }
 0x1a7   :  { %v75_v31 = vstv %s94_s5 }
 0x1a8   :  { %76 = vst [vmem:[#allocation7] sm:$0xff] %v75_v31 }
 0x1a9   :  { %161 = shalt.err (!%p158_p6)
}
 0x1aa   :  { %s162_s9 = scalar_lea.hbm %s234_s2, 128 }
 0x1ab   :  { %p163_p7 = scmp.ne.s32.totalorder %s234_s2, %s162_s9  ;;  %p166_p8 = scmp.lt.u32.totalorder %s162_s9, %s234_s2 }
 0x1ad   :  { %p168_p9 = pnand %p166_p8, %p163_p7 }
 0x1af   :  { %171 = shalt.err (!%p168_p9)
}
 0x1b0   :  { %86 = dma.vmem_to_hbm [thread:$0]  %s84_s4, 128, %s234_s2, [#allocation4]  }
 0x1b1   :  { %176 = dma.done.wait [#allocation4], 128  }
 0x1b2   :  { %177 = vsyncadd [#allocation4], 4294967168 }
 0x1b3   :  { %90 = vsyncpa [#allocation3], 1 }
 0x1b4   :  { %91 = vsyncpa [#allocation6], 1 }
 0x1b5   :  { %92 = vsyncpa [#allocation4], 1 }

</bundles_post_ra>
